<compile_context>
chip_gen: v7x
topology: tpu7x:2x2x1
jax: 0.10.0
libtpu: 0.0.40
codegen_flags: <defaults>
</compile_context>

<pallas_src>
import jax
import jax.numpy as jnp
from jax.experimental import pallas as pl
from jax.experimental.pallas import tpu as pltpu


# -----------------------------------------------------------------------------
# Kernel: one tile of sout * sigmoid(pred)
# -----------------------------------------------------------------------------
def _oriatt_kernel(s_ref, p_ref, o_ref):
    s = s_ref[...].astype(jnp.float32)
    p = p_ref[...].astype(jnp.float32)
    o_ref[...] = (s * jax.nn.sigmoid(p)).astype(o_ref.dtype)


# -----------------------------------------------------------------------------
# Wrapper: flatten to a lane-dense (rows, 1024) slab, tile over rows.
# -----------------------------------------------------------------------------
_LANE_WIDTH = 1024          # 8 * 128 lanes -> wide, unmasked stores
_SUBLANE = 8
_MAX_TILE_ROWS = 512        # 512 x 1024 f32 = 2 MiB per operand tile


def ori_att(sout, pred):
    assert sout.shape == pred.shape, (sout.shape, pred.shape)
    orig_shape = sout.shape
    out_dtype = jnp.result_type(sout.dtype, pred.dtype)
    n = sout.size

    # Rows of the lane-dense 2-D view, padded so (rows, _LANE_WIDTH) tiles fit.
    rows = pl.cdiv(n, _LANE_WIDTH)
    tile_rows = min(max(rows, _SUBLANE), _MAX_TILE_ROWS)
    tile_rows = pl.cdiv(tile_rows, _SUBLANE) * _SUBLANE
    rows_p = pl.cdiv(rows, tile_rows) * tile_rows
    total = rows_p * _LANE_WIDTH

    def _to_2d(a):
        flat = a.reshape(-1).astype(out_dtype)
        if total != n:
            flat = jnp.pad(flat, (0, total - n))
        return flat.reshape(rows_p, _LANE_WIDTH)

    s2 = _to_2d(sout)
    p2 = _to_2d(pred)

    out2 = pl.pallas_call(
        _oriatt_kernel,
        out_shape=jax.ShapeDtypeStruct((rows_p, _LANE_WIDTH), out_dtype),
        grid=(rows_p // tile_rows,),
        in_specs=[
            pl.BlockSpec((tile_rows, _LANE_WIDTH), lambda i: (i, 0)),
            pl.BlockSpec((tile_rows, _LANE_WIDTH), lambda i: (i, 0)),
        ],
        out_specs=pl.BlockSpec((tile_rows, _LANE_WIDTH), lambda i: (i, 0)),
        compiler_params=pltpu.CompilerParams(
            dimension_semantics=("parallel",)),
    )(s2, p2)

    return out2.reshape(-1)[:n].reshape(orig_shape)


@jax.jit
def oriatt_forward(sout, pred):
    """OriAtt.forward: sout.mul(torch.sigmoid(pred)) — NCHW in / NCHW out."""
    return ori_att(sout, pred)


# -----------------------------------------------------------------------------
# Pure-JAX reference (correctness check only)
# -----------------------------------------------------------------------------
def _ref_forward(sout, pred):
    return sout * jax.nn.sigmoid(pred)


# -----------------------------------------------------------------------------
if __name__ == "__main__":
    # Small shapes consistent with the module: batch=2, channels=4, 16x16.
    N, C, H, W = 2, 4, 16, 16

    key = jax.random.PRNGKey(0)
    k_sout, k_pred = jax.random.split(key)
    sout = jax.random.normal(k_sout, (N, C, H, W), jnp.float32)
    pred = jax.random.normal(k_pred, (N, C, H, W), jnp.float32)

    out = jax.block_until_ready(oriatt_forward(sout, pred))
    ref = jax.block_until_ready(_ref_forward(sout, pred))

    assert out.shape == (N, C, H, W), out.shape
    assert jnp.allclose(out, ref, atol=1e-5, rtol=1e-5), float(
        jnp.max(jnp.abs(out - ref)))
    print("KERNEL_OK")
</pallas_src>

<mosaic_0001>
module attributes {stable_mosaic.version = 11 : i64} {
  func.func @_oriatt_kernel(%arg0: i32, %arg1: memref<8x1024xf32, #tpu.memory_space<vmem>>, %arg2: memref<8x1024xf32, #tpu.memory_space<vmem>>, %arg3: memref<8x1024xf32, #tpu.memory_space<vmem>>) attributes {dimension_semantics = [#tpu.dimension_semantics<parallel>], iteration_bounds = array<i64: 1>, scalar_prefetch = 0 : i64, scratch_operands = 0 : i64, tpu.core_type = #tpu.core_type<tc>, window_params = [{transform_indices = @transform_0, window_bounds = array<i64: 8, 1024>}, {transform_indices = @transform_1, window_bounds = array<i64: 8, 1024>}, {transform_indices = @transform_2, window_bounds = array<i64: 8, 1024>}]} {
    %c0 = arith.constant 0 : index
    %c0_0 = arith.constant 0 : index
    %0 = vector.load %arg1[%c0, %c0_0] : memref<8x1024xf32, #tpu.memory_space<vmem>>, vector<8x1024xf32>
    %c0_1 = arith.constant 0 : index
    %c0_2 = arith.constant 0 : index
    %1 = vector.load %arg2[%c0_1, %c0_2] : memref<8x1024xf32, #tpu.memory_space<vmem>>, vector<8x1024xf32>
    %2 = arith.negf %1 : vector<8x1024xf32>
    %3 = math.exp %2 : vector<8x1024xf32>
    %cst = arith.constant 1.000000e+00 : f32
    %4 = vector.broadcast %cst : f32 to vector<8x1024xf32>
    %5 = arith.addf %4, %3 : vector<8x1024xf32>
    %6 = arith.divf %4, %5 : vector<8x1024xf32>
    %7 = arith.mulf %0, %6 : vector<8x1024xf32>
    %c0_3 = arith.constant 0 : index
    %c0_4 = arith.constant 0 : index
    %8 = vector.load %arg3[%c0_3, %c0_4] : memref<8x1024xf32, #tpu.memory_space<vmem>>, vector<8x1024xf32>
    tpu.vector_store %arg3[%c0_3, %c0_4], %7 {strides = array<i32>} : memref<8x1024xf32, #tpu.memory_space<vmem>>, vector<8x1024xf32>,
    return
  }
  func.func @transform_0(%arg0: i32) -> (i32, i32) {
    %c0_i32 = arith.constant 0 : i32
    %c0_i32_0 = arith.constant 0 : i32
    return %arg0, %c0_i32 : i32, i32
  }
  func.func @transform_1(%arg0: i32) -> (i32, i32) {
    %c0_i32 = arith.constant 0 : i32
    %c0_i32_0 = arith.constant 0 : i32
    return %arg0, %c0_i32 : i32, i32
  }
  func.func @transform_2(%arg0: i32) -> (i32, i32) {
    %c0_i32 = arith.constant 0 : i32
    %c0_i32_0 = arith.constant 0 : i32
    return %arg0, %c0_i32 : i32, i32
  }
}

</mosaic_0001>

<bundles_post_ra>
// kernel: oriatt_forward.1
= control target key start
LH: loop header
LB: loop body
LE: loop exit
PB: predicated region body
PF: predicated region fallthrough
CT: control target
= control target key end

     0   :  { %s222_s1 = inlined_call_operand.vmem [shape: f32[8,1024], index: 1, kind: input, shape index: {}]   ;;  %s223_s0 = inlined_call_operand.vmem [shape: f32[8,1024], index: 0, kind: input, shape index: {}]   ;;  %s224_s2 = inlined_call_operand.vmem [shape: f32[8,1024], index: 2, kind: output, shape index: {}]  }
   0x1   :  { %v19_v0 = vld [vmem:[%s222_s1] sm:$0xff]  ;;  %v20_v2 = vld [vmem:[%s222_s1 + $0x8] sm:$0xff]  ;;  %v21_v3 = vld [vmem:[%s222_s1 + $0x10] sm:$0xff] }
   0x2   :  { %v95_v1 = vmul.f32 -1.442695, %v19_v0  ;;  %v96_v4 = vmul.f32 -1.442695, %v20_v2  ;;  %v97_v5 = vmul.f32 -1.442695, %v21_v3 }
   0x3   :  { %v22_v6 = vld [vmem:[%s222_s1 + $0x18] sm:$0xff]  ;;  %v23_v8 = vld [vmem:[%s222_s1 + $0x20] sm:$0xff]  ;;  %v24_v10 = vld [vmem:[%s222_s1 + $0x28] sm:$0xff] }
   0x4   :  { %103 = vpow2.f32 %v95_v1  ;;  %v98_v7 = vmul.f32 -1.442695, %v22_v6  ;;  %v99_v9 = vmul.f32 -1.442695, %v23_v8  ;;  %v25_v11 = vld [vmem:[%s222_s1 + $0x30] sm:$0xff]  ;;  %v26_v14 = vld [vmem:[%s222_s1 + $0x38] sm:$0xff] }
   0x5   :  { %105 = vpow2.f32 %v96_v4  ;;  %v100_v12 = vmul.f32 -1.442695, %v24_v10  ;;  %v101_v13 = vmul.f32 -1.442695, %v25_v11  ;;  %v102_v15 = vmul.f32 -1.442695, %v26_v14 }
   0x6   :  { %107 = vpow2.f32 %v97_v5  ;;  %v11_v32 = vld [vmem:[%s223_s0] sm:$0xff]  ;;  %v12_v33 = vld [vmem:[%s223_s0 + $0x8] sm:$0xff]  ;;  %v13_v35 = vld [vmem:[%s223_s0 + $0x10] sm:$0xff] }
   0x7   :  { %109 = vpow2.f32 %v98_v7  ;;  %v14_v38 = vld [vmem:[%s223_s0 + $0x18] sm:$0xff]  ;;  %v15_v41 = vld [vmem:[%s223_s0 + $0x20] sm:$0xff]  ;;  %v16_v44 = vld [vmem:[%s223_s0 + $0x28] sm:$0xff] }
   0x8   :  { %111 = vpow2.f32 %v99_v9  ;;  %v17_v47 = vld [vmem:[%s223_s0 + $0x30] sm:$0xff]  ;;  %v18_v50 = vld [vmem:[%s223_s0 + $0x38] sm:$0xff] }
   0x9   :  { %113 = vpow2.f32 %v100_v12 }
   0xa   :  { %115 = vpow2.f32 %v101_v13 }
   0xb   :  { %117 = vpow2.f32 %v102_v15 }
   0xe   :  { %v104_v16 = vpop.eup %103 }
   0xf   :  { %v106_v17 = vpop.eup %105  ;;  %v51_v18 = vadd.f32 1.0, %v104_v16 }
  0x10   :  { %v108_v19 = vpop.eup %107  ;;  %v52_v20 = vadd.f32 1.0, %v106_v17 }
  0x11   :  { %v110_v21 = vpop.eup %109  ;;  %119 = vrcp.f32 %v51_v18  ;;  %v53_v22 = vadd.f32 1.0, %v108_v19 }
  0x12   :  { %v112_v23 = vpop.eup %111  ;;  %121 = vrcp.f32 %v52_v20  ;;  %v54_v24 = vadd.f32 1.0, %v110_v21 }
  0x13   :  { %v114_v25 = vpop.eup %113  ;;  %123 = vrcp.f32 %v53_v22  ;;  %v55_v26 = vadd.f32 1.0, %v112_v23 }
  0x14   :  { %v116_v27 = vpop.eup %115  ;;  %125 = vrcp.f32 %v54_v24  ;;  %v56_v28 = vadd.f32 1.0, %v114_v25 }
  0x15   :  { %v118_v29 = vpop.eup %117  ;;  %127 = vrcp.f32 %v55_v26  ;;  %v57_v30 = vadd.f32 1.0, %v116_v27 }
  0x16   :  { %129 = vrcp.f32 %v56_v28  ;;  %v58_v31 = vadd.f32 1.0, %v118_v29 }
  0x17   :  { %131 = vrcp.f32 %v57_v30 }
  0x18   :  { %133 = vrcp.f32 %v58_v31 }
  0x1b   :  { %v120_v34 = vpop.eup %119 }
  0x1c   :  { %v122_v36 = vpop.eup %121  ;;  %v75_v37 = vmul.f32 %v120_v34, %v11_v32 }
  0x1d   :  { %v124_v39 = vpop.eup %123  ;;  %v76_v40 = vmul.f32 %v122_v36, %v12_v33 }
  0x1e   :  { %v126_v42 = vpop.eup %125  ;;  %83 = vst [vmem:[%s224_s2] sm:$0xff] %v75_v37  ;;  %v77_v43 = vmul.f32 %v124_v39, %v13_v35 }
  0x1f   :  { %v128_v45 = vpop.eup %127  ;;  %84 = vst [vmem:[%s224_s2 + $0x8] sm:$0xff] %v76_v40  ;;  %v78_v46 = vmul.f32 %v126_v42, %v14_v38 }
  0x20   :  { %v130_v48 = vpop.eup %129  ;;  %85 = vst [vmem:[%s224_s2 + $0x10] sm:$0xff] %v77_v43  ;;  %v79_v49 = vmul.f32 %v128_v45, %v15_v41 }
  0x21   :  { %v132_v51 = vpop.eup %131  ;;  %86 = vst [vmem:[%s224_s2 + $0x18] sm:$0xff] %v78_v46  ;;  %v80_v52 = vmul.f32 %v130_v48, %v16_v44 }
  0x22   :  { %v134_v53 = vpop.eup %133  ;;  %87 = vst [vmem:[%s224_s2 + $0x20] sm:$0xff] %v79_v49  ;;  %v81_v54 = vmul.f32 %v132_v51, %v17_v47 }
  0x23   :  { %88 = vst [vmem:[%s224_s2 + $0x28] sm:$0xff] %v80_v52  ;;  %v82_v55 = vmul.f32 %v134_v53, %v18_v50 }
  0x24   :  { %89 = vst [vmem:[%s224_s2 + $0x30] sm:$0xff] %v81_v54 }
  0x25   :  { %90 = vst [vmem:[%s224_s2 + $0x38] sm:$0xff] %v82_v55 }

</bundles_post_ra>
